<compile_context>
chip_gen: v7x
topology: tpu7x:2x2x1
jax: 0.10.0
libtpu: 0.0.40
codegen_flags: <defaults>
</compile_context>

<pallas_src>
import numpy as np
import jax
import jax.numpy as jnp
from jax.experimental import pallas as pl
from jax.experimental.pallas import tpu as pltpu


# ----------------------- host-side helpers (glue, plain python) ---------------
def is_prime(n):
    if n <= 1:
        return False
    for i in range(2, int(n ** 0.5) + 1):
        if n % i == 0:
            return False
    return True


def generate_first_n_primes(n):
    primes, num = [], 2
    while len(primes) < n:
        if is_prime(num):
            primes.append(num)
        num += 1
    return primes


def generate_moduli(max_modulus, primes_only):
    if primes_only:
        return generate_first_n_primes(max_modulus)
    return list(range(2, max_modulus + 2))


def generate_multi_hot_encoding(max_len, moduli, start_idx=1):
    total = sum(moduli)
    mh = np.zeros((max_len, total), dtype=np.float32)
    for n in range(max_len):
        cur = 0
        for m in moduli:
            mh[n, cur + ((n + start_idx) % m)] = 1.0
            cur += m
    return mh


def round_up(x, m):
    return ((x + m - 1) // m) * m


# ----------------------------- Pallas kernel ----------------------------------
def pe_table_kernel(mh_ref, w_ref, o_ref):
    # mh_ref : (L_pad, S_pad)  multi-hot rows, zero-padded, with a "1" bias
    #                          column at index S (homogeneous coordinate)
    # w_ref  : (S_pad, D_pad)  fused, pre-scaled weight; row S holds the fused bias
    # o_ref  : (L_pad, D_pad)
    # Single MXU matmul — bias rides the already-padded K dimension for free.
    o_ref[...] = jnp.dot(mh_ref[...], w_ref[...], preferred_element_type=jnp.float32)


def build_position_table(multi_hot_np, w_linear, b_linear, w_proc, b_proc, moduli):
    """Compute the full (max_len, target_dim) position-encoding table with one
    Pallas call.  Divisor fold, linear fusion, bias fold and padding all happen
    on the host (numpy) at init time."""
    max_len, S = multi_hot_np.shape
    D = int(np.asarray(w_linear).shape[0])
    m = float(len(moduli))  # row sum of every multi-hot row (compile-time const)

    # Guard the folded divisor: every row must sum to exactly len(moduli).
    row_sums = multi_hot_np.sum(axis=-1)
    assert np.all(row_sums == m), "multi-hot row sums != len(moduli); divisor fold invalid"

    # Pull params to host once and fuse:  out = mh @ W_comb + b_comb
    wl = np.asarray(w_linear, dtype=np.float32)   # (D, S)
    bl = np.asarray(b_linear, dtype=np.float32)   # (D,)
    wp = np.asarray(w_proc, dtype=np.float32)     # (D, D)
    bp = np.asarray(b_proc, dtype=np.float32)     # (D,)
    w_comb = (wl.T / m) @ wp.T                    # (S, D)
    b_comb = (bl / m) @ wp.T + bp                 # (D,)

    # Lane/sublane-dense padding: last dim -> 128-multiple, 2nd-last -> 8-multiple.
    # +1 on S for the homogeneous bias column (fits inside the same 128 pad).
    S_pad = round_up(S + 1, 128)
    D_pad = round_up(D, 128)
    L_pad = round_up(max_len, 8)

    mh_p = np.zeros((L_pad, S_pad), dtype=np.float32)
    mh_p[:max_len, :S] = multi_hot_np
    mh_p[:max_len, S] = 1.0                       # bias column (homogeneous coord)

    w_p = np.zeros((S_pad, D_pad), dtype=np.float32)
    w_p[:S, :D] = w_comb
    w_p[S, :D] = b_comb                           # bias folded into weight row S

    mh_p = jnp.asarray(mh_p)
    w_p = jnp.asarray(w_p)

    # No grid, no pipelining: whole arrays resident in VMEM (L_pad*S_pad + S_pad*D_pad
    # + L_pad*D_pad f32 << scoped VMEM on all generations at these sizes).
    table_padded = pl.pallas_call(
        pe_table_kernel,
        out_shape=jax.ShapeDtypeStruct((L_pad, D_pad), jnp.float32),
        in_specs=[
            pl.BlockSpec(memory_space=pltpu.MemorySpace.VMEM),
            pl.BlockSpec(memory_space=pltpu.MemorySpace.VMEM),
        ],
        out_specs=pl.BlockSpec(memory_space=pltpu.MemorySpace.VMEM),
    )(mh_p, w_p)

    return table_padded[:max_len, :D]  # (max_len, D)


def position_encoding_forward(table, current_length):
    """Equivalent of PositionEncodingModule.forward(current_length):
    pure slice of the precomputed table -> (1, L, D).  No recompiles."""
    return table[:current_length][None, :, :]


# -------------------------------- driver ---------------------------------------
if __name__ == "__main__":
    # module hyper-params (small, consistent with __init__)
    max_modulus = 8          # -> first 8 primes, total_moduli_sum = 77
    max_len = 64
    target_dim = 32
    primes_only = True
    current_length = 16

    moduli = generate_moduli(max_modulus, primes_only)
    total_moduli_sum = sum(moduli)

    # buffers / parameters, deterministic init
    multi_hot_np = generate_multi_hot_encoding(max_len, moduli, start_idx=1)

    key = jax.random.PRNGKey(0)
    k1, k2, k3, k4 = jax.random.split(key, 4)
    # nn.init.normal_(weight, std=0.02); biases PyTorch-default-style uniform
    w_linear = 0.02 * jax.random.normal(k1, (target_dim, total_moduli_sum), jnp.float32)
    b_linear = (jax.random.uniform(k2, (target_dim,), jnp.float32) * 2 - 1) / np.sqrt(total_moduli_sum)
    w_proc = 0.02 * jax.random.normal(k3, (target_dim, target_dim), jnp.float32)
    b_proc = (jax.random.uniform(k4, (target_dim,), jnp.float32) * 2 - 1) / np.sqrt(target_dim)

    # Build the full position table ONCE with the Pallas kernel (init-time work).
    table = build_position_table(multi_hot_np, w_linear, b_linear, w_proc, b_proc, moduli)
    table = jax.block_until_ready(table)

    # forward(current_length) is a slice — no per-length recompiles.
    out = position_encoding_forward(table, current_length)
    out = jax.block_until_ready(out)

    # pure-JAX reference check (original, unfused, unpadded math)
    multi_hot = jnp.asarray(multi_hot_np)
    mh = multi_hot[:current_length][None]                                   # (1, L, S)
    ref = (mh @ w_linear.T + b_linear) / jnp.sum(mh, axis=-1, keepdims=True)
    ref = ref @ w_proc.T + b_proc
    assert out.shape == (1, current_length, target_dim)
    np.testing.assert_allclose(np.asarray(out), np.asarray(ref), rtol=1e-4, atol=1e-5)

    # also check the full length to confirm slicing / table build is right
    out_full = position_encoding_forward(table, max_len)
    mh_full = multi_hot[None]
    ref_full = (mh_full @ w_linear.T + b_linear) / jnp.sum(mh_full, axis=-1, keepdims=True)
    ref_full = ref_full @ w_proc.T + b_proc
    np.testing.assert_allclose(np.asarray(out_full), np.asarray(ref_full), rtol=1e-4, atol=1e-5)

    print("KERNEL_OK")
</pallas_src>

<mosaic_0001>
module attributes {stable_mosaic.version = 11 : i64} {
  func.func @pe_table_kernel(%arg0: memref<64x128xf32, #tpu.memory_space<vmem>>, %arg1: memref<128x128xf32, #tpu.memory_space<vmem>>, %arg2: memref<64x128xf32, #tpu.memory_space<vmem>>) attributes {dimension_semantics = [], scalar_prefetch = 0 : i64, scratch_operands = 0 : i64, tpu.core_type = #tpu.core_type<tc>} {
    %c0 = arith.constant 0 : index
    %c0_0 = arith.constant 0 : index
    %0 = vector.load %arg0[%c0, %c0_0] : memref<64x128xf32, #tpu.memory_space<vmem>>, vector<64x128xf32>
    %c0_1 = arith.constant 0 : index
    %c0_2 = arith.constant 0 : index
    %1 = vector.load %arg1[%c0_1, %c0_2] : memref<128x128xf32, #tpu.memory_space<vmem>>, vector<128x128xf32>
    %cst = arith.constant dense<0.000000e+00> : vector<64x128xf32>
    %2 = tpu.matmul %0, %1, %cst {dimension_numbers = #tpu.dot_dimension_numbers<[1], [0], [0], [1], [0, 0, 1, 1], [], []>} : vector<64x128xf32>, vector<128x128xf32>, vector<64x128xf32> -> vector<64x128xf32>
    %c0_3 = arith.constant 0 : index
    %c0_4 = arith.constant 0 : index
    %3 = vector.load %arg2[%c0_3, %c0_4] : memref<64x128xf32, #tpu.memory_space<vmem>>, vector<64x128xf32>
    tpu.vector_store %arg2[%c0_3, %c0_4], %2 {strides = array<i32>} : memref<64x128xf32, #tpu.memory_space<vmem>>, vector<64x128xf32>,
    return
  }
}

</mosaic_0001>

<bundles_post_ra>
// kernel: tpu_custom_call.1
= control target key start
LH: loop header
LB: loop body
LE: loop exit
PB: predicated region body
PF: predicated region fallthrough
CT: control target
= control target key end

     0   :  { %7 = vsyncpa [#allocation3], 0  ;;  %s453_s0 = inlined_call_operand.hbm [shape: f32[64,128], index: 0, kind: input, shape index: {}]   ;;  %s454_s1 = inlined_call_operand.hbm [shape: f32[128,128], index: 1, kind: input, shape index: {}]   ;;  %s455_s2 = inlined_call_operand.hbm [shape: f32[64,128], index: 2, kind: output, shape index: {}]  }
   0x1   :  { %8 = vsyncpa [#allocation6], 0 }
   0x2   :  { %9 = vsyncpa [#allocation4], 0  ;;  %s388_s9 = smov [#allocation2]   ;;  %s316_s13 = scalar_lea.hbm %s453_s0, 1024 }
   0x3   :  { %s15_s10 = sshll.u32 %s388_s9, 4  ;;  %p317_p0 = scmp.ne.s32.totalorder %s453_s0, %s316_s13  ;;  %s16_s10 = int_to_ptr.vmem [resolvable:$true] %s15_s10 }
   0x4   :  { %p320_p1 = scmp.lt.u32.totalorder %s316_s13, %s453_s0 }
   0x6   :  { %p322_p2 = pnand %p320_p1, %p317_p0 }
   0x8   :  { %325 = shalt.err (!%p322_p2)
}
   0x9   :  { %s326_s18 = scalar_lea.vmem %s16_s10, 1024  ;;  %p331_p4 = scmp.lt.s32.totalorder %s16_s10, %s16_s10 }
   0xa   :  { %p327_p3 = scmp.ne.s32.totalorder %s16_s10, %s326_s18  ;;  %p332_p5 = scmp.lt.s32.totalorder %s326_s18, %s326_s18 }
   0xc   :  { %p333_p6 = por %p332_p5, %p331_p4 }
   0xe   :  { %p334_p7 = pnand %p333_p6, %p327_p3 }
  0x10   :  { %337 = shalt.err (!%p334_p7)
}
  0x11   :  { %s389_s19 = smov 128   ;;  %s390_s20 = smov 8  }
  0x12   :  { %21 = dma.hbm_to_vmem [thread:$0]  %s453_s0, 1024, %s16_s10, [#allocation3], %s389_s19, %s389_s19, %s390_s20  }
  0x13   :  { %s391_s23 = smov [#allocation5]   ;;  %s338_s27 = scalar_lea.hbm %s454_s1, 2048 }
  0x14   :  { %s27_s24 = sshll.u32 %s391_s23, 4  ;;  %p339_p8 = scmp.ne.s32.totalorder %s454_s1, %s338_s27  ;;  %s28_s24 = int_to_ptr.vmem [resolvable:$true] %s27_s24 }
  0x15   :  { %p342_p9 = scmp.lt.u32.totalorder %s338_s27, %s454_s1 }
  0x17   :  { %p344_p10 = pnand %p342_p9, %p339_p8 }
  0x19   :  { %347 = shalt.err (!%p344_p10)
}
  0x1a   :  { %s348_s4 = scalar_lea.vmem %s28_s24, 2048  ;;  %p353_p12 = scmp.lt.s32.totalorder %s28_s24, %s28_s24 }
  0x1b   :  { %p349_p11 = scmp.ne.s32.totalorder %s28_s24, %s348_s4  ;;  %p354_p13 = scmp.lt.s32.totalorder %s348_s4, %s348_s4 }
  0x1d   :  { %p355_p0 = por %p354_p13, %p353_p12 }
  0x1f   :  { %p356_p1 = pnand %p355_p0, %p349_p11 }
  0x21   :  { %359 = shalt.err (!%p356_p1)
}
  0x22   :  { %33 = dma.hbm_to_vmem [thread:$0]  %s454_s1, 2048, %s28_s24, [#allocation6], %s389_s19, %s389_s19, %s390_s20  }
  0x23   :  { %382 = dma.done.wait [#allocation3], 1024  }
  0x24   :  { %383 = vsyncadd [#allocation3], 4294966272 }
  0x25   :  { %384 = dma.done.wait [#allocation6], 2048  }
  0x26   :  { %385 = vsyncadd [#allocation6], 4294965248  ;;  %v48_v0 = vld [vmem:[#allocation5] sm:$0xff]  ;;  %v49_v1 = vld [vmem:[#allocation5 + $0x8] sm:$0xff]  ;;  %s392_s1 = smov [#allocation7]  }
  0x27   :  { %v50_v2 = vld [vmem:[#allocation5 + $0x10] sm:$0xff]  ;;  %v263_v3 = vpack.c.bf16 %v49_v1, %v48_v0  ;;  %v51_v4 = vld [vmem:[#allocation5 + $0x18] sm:$0xff]  ;;  %v52_v6 = vld [vmem:[#allocation5 + $0x20] sm:$0xff]  ;;  %s182_s6 = sshll.u32 %s392_s1, 4  ;;  %s183_s6 = int_to_ptr.vmem [resolvable:$true] %s182_s6 }
  0x28   :  { %v267_v5 = vpack.c.bf16 %v51_v4, %v50_v2  ;;  %v53_v7 = vld [vmem:[#allocation5 + $0x28] sm:$0xff]  ;;  %v40_v9 = vld [vmem:[#allocation2] sm:$0xff]  ;;  %v54_v11 = vld [vmem:[#allocation5 + $0x30] sm:$0xff]  ;;  %s360_s7 = scalar_lea.vmem %s183_s6, 1024  ;;  %p365_p3 = scmp.lt.s32.totalorder %s183_s6, %s183_s6 }
  0x29   :  { %264 = vmatprep.subr.bf16.mxu0 %v263_v3  ;;  %295 = vmatprep.subr.bf16.mxu1 %v263_v3  ;;  %v271_v8 = vpack.c.bf16 %v53_v7, %v52_v6  ;;  %v44_v10 = vld [vmem:[#allocation2 + $0x20] sm:$0xff]  ;;  %v55_v12 = vld [vmem:[#allocation5 + $0x38] sm:$0xff]  ;;  %v57_v15 = vld [vmem:[#allocation5 + $0x48] sm:$0xff]  ;;  %p361_p2 = scmp.ne.s32.totalorder %s183_s6, %s360_s7  ;;  %p366_p4 = scmp.lt.s32.totalorder %s360_s7, %s360_s7 }
  0x2a   :  { %266 = vmatpush3.bf16.msra.mxu0 %v263_v3  ;;  %303 = vmatpush3.bf16.msra.mxu1 %v263_v3  ;;  %v275_v13 = vpack.c.bf16 %v55_v12, %v54_v11  ;;  %v56_v14 = vld [vmem:[#allocation5 + $0x40] sm:$0xff]  ;;  %v58_v17 = vld [vmem:[#allocation5 + $0x50] sm:$0xff]  ;;  %v59_v18 = vld [vmem:[#allocation5 + $0x58] sm:$0xff] }
  0x2b   :  { %268 = vmatprep.subr.bf16.mxu0 %v267_v5  ;;  %296 = vmatprep.subr.bf16.mxu1 %v267_v5  ;;  %v279_v16 = vpack.c.bf16 %v57_v15, %v56_v14  ;;  %v283_v19 = vpack.c.bf16 %v59_v18, %v58_v17  ;;  %v60_v20 = vld [vmem:[#allocation5 + $0x60] sm:$0xff]  ;;  %v61_v21 = vld [vmem:[#allocation5 + $0x68] sm:$0xff]  ;;  %v62_v23 = vld [vmem:[#allocation5 + $0x70] sm:$0xff]  ;;  %p367_p5 = por %p366_p4, %p365_p3 }
  0x2c   :  { %251 = vmatprep.mubr.f32.mxu0 %v40_v9  ;;  %257 = vmatprep.mubr.f32.mxu1 %v44_v10  ;;  %v287_v22 = vpack.c.bf16 %v61_v21, %v60_v20  ;;  %v63_v24 = vld [vmem:[#allocation5 + $0x78] sm:$0xff]  ;;  %v41_v26 = vld [vmem:[#allocation2 + $0x8] sm:$0xff]  ;;  %v42_v28 = vld [vmem:[#allocation2 + $0x10] sm:$0xff] }
  0x2d   :  { %v291_v25 = vpack.c.bf16 %v63_v24, %v62_v23  ;;  %v45_v27 = vld [vmem:[#allocation2 + $0x28] sm:$0xff]  ;;  %v46_v29 = vld [vmem:[#allocation2 + $0x30] sm:$0xff]  ;;  %v43_v30 = vld [vmem:[#allocation2 + $0x18] sm:$0xff]  ;;  %p368_p6 = pnand %p367_p5, %p361_p2 }
  0x2e   :  { %270 = vmatpush3.bf16.msra.mxu0 %v267_v5  ;;  %304 = vmatpush3.bf16.msra.mxu1 %v267_v5  ;;  %v47_v31 = vld [vmem:[#allocation2 + $0x38] sm:$0xff] }
  0x2f   :  { %272 = vmatprep.subr.bf16.mxu0 %v271_v8  ;;  %297 = vmatprep.subr.bf16.mxu1 %v271_v8 }
  0x32   :  { %274 = vmatpush3.bf16.msra.mxu0 %v271_v8  ;;  %305 = vmatpush3.bf16.msra.mxu1 %v271_v8 }
  0x33   :  { %276 = vmatprep.subr.bf16.mxu0 %v275_v13  ;;  %298 = vmatprep.subr.bf16.mxu1 %v275_v13 }
  0x36   :  { %278 = vmatpush3.bf16.msra.mxu0 %v275_v13  ;;  %306 = vmatpush3.bf16.msra.mxu1 %v275_v13 }
  0x37   :  { %280 = vmatprep.subr.bf16.mxu0 %v279_v16  ;;  %299 = vmatprep.subr.bf16.mxu1 %v279_v16 }
  0x3a   :  { %282 = vmatpush3.bf16.msra.mxu0 %v279_v16  ;;  %307 = vmatpush3.bf16.msra.mxu1 %v279_v16 }
  0x3b   :  { %284 = vmatprep.subr.bf16.mxu0 %v283_v19  ;;  %300 = vmatprep.subr.bf16.mxu1 %v283_v19 }
  0x3e   :  { %286 = vmatpush3.bf16.msra.mxu0 %v283_v19  ;;  %308 = vmatpush3.bf16.msra.mxu1 %v283_v19 }
  0x3f   :  { %288 = vmatprep.subr.bf16.mxu0 %v287_v22  ;;  %301 = vmatprep.subr.bf16.mxu1 %v287_v22 }
  0x42   :  { %290 = vmatpush3.bf16.msra.mxu0 %v287_v22  ;;  %309 = vmatpush3.bf16.msra.mxu1 %v287_v22 }
  0x43   :  { %292 = vmatprep.subr.bf16.mxu0 %v291_v25  ;;  %302 = vmatprep.subr.bf16.mxu1 %v291_v25 }
  0x46   :  { %294 = vmatpush3.bf16.msra.mxu0 %v291_v25  ;;  %310 = vmatpush3.bf16.msra.mxu1 %v291_v25 }
  0x49   :  { %252 = vmatmul.mubr.f32.vlgmr.msra.gmra.mrb[0].mxu0 %v41_v26  ;;  %258 = vmatmul.mubr.f32.vlgmr.msra.gmra.mrb[0].mxu1 %v45_v27 }
  0x4a   :  { %254 = vmatprep.mubr.f32.mxu0 %v42_v28  ;;  %260 = vmatprep.mubr.f32.mxu1 %v46_v29 }
  0x4d   :  { %255 = vmatmul.mubr.f32.gmra.mrb[2].mxu0 %v43_v30  ;;  %261 = vmatmul.mubr.f32.gmra.mrb[2].mxu1 %v47_v31 }
 0x11c   :  { %v253_v32 = vpop.f32.mrb[0].mxu0  ;;  %v259_v33 = vpop.f32.mrb[0].mxu1 }
 0x11d   :  { %170 = vst [vmem:[#allocation7 + $0x8] sm:$0xff] %v253_v32  ;;  %174 = vst [vmem:[#allocation7 + $0x28] sm:$0xff] %v259_v33  ;;  %v130_v34 = vpop.f32.mrb[1].mxu0  ;;  %v150_v35 = vpop.f32.mrb[1].mxu1 }
 0x11e   :  { %169 = vst [vmem:[#allocation7] sm:$0xff] %v130_v34  ;;  %173 = vst [vmem:[#allocation7 + $0x20] sm:$0xff] %v150_v35 }
 0x120   :  { %v256_v36 = vpop.f32.mrb[2].mxu0  ;;  %v262_v37 = vpop.f32.mrb[2].mxu1 }
 0x121   :  { %172 = vst [vmem:[#allocation7 + $0x18] sm:$0xff] %v256_v36  ;;  %176 = vst [vmem:[#allocation7 + $0x38] sm:$0xff] %v262_v37  ;;  %v140_v38 = vpop.f32.mrb[3].mxu0  ;;  %v160_v39 = vpop.f32.mrb[3].mxu1 }
 0x122   :  { %171 = vst [vmem:[#allocation7 + $0x10] sm:$0xff] %v140_v38  ;;  %175 = vst [vmem:[#allocation7 + $0x30] sm:$0xff] %v160_v39 }
 0x123   :  { %371 = shalt.err (!%p368_p6)
}
 0x124   :  { %s372_s10 = scalar_lea.hbm %s455_s2, 1024 }
 0x125   :  { %p373_p7 = scmp.ne.s32.totalorder %s455_s2, %s372_s10  ;;  %p376_p8 = scmp.lt.u32.totalorder %s372_s10, %s455_s2 }
 0x127   :  { %p378_p9 = pnand %p376_p8, %p373_p7 }
 0x129   :  { %381 = shalt.err (!%p378_p9)
}
 0x12a   :  { %188 = dma.vmem_to_hbm [thread:$0]  %s183_s6, 1024, %s455_s2, [#allocation4], %s389_s19, %s389_s19, %s390_s20  }
 0x12b   :  { %386 = dma.done.wait [#allocation4], 1024  }
 0x12c   :  { %387 = vsyncadd [#allocation4], 4294966272 }
 0x12d   :  { %192 = vsyncpa [#allocation3], 1 }
 0x12e   :  { %193 = vsyncpa [#allocation6], 1 }
 0x12f   :  { %194 = vsyncpa [#allocation4], 1 }

</bundles_post_ra>
